<compile_context>
chip_gen: v7x
topology: tpu7x:2x2x1
jax: 0.10.0
libtpu: 0.0.40
codegen_flags: <defaults>
</compile_context>

<pallas_src>
import jax
import jax.numpy as jnp
from jax.experimental import pallas as pl
from jax.experimental.pallas import tpu as pltpu


def _round_up(x, m):
    return ((x + m - 1) // m) * m


# --------------------------------------------------------------------------- #
# Kernel
# --------------------------------------------------------------------------- #
def lstm_model_kernel(x_ref, w_emb_ref, b_emb_ref, w_g_ref, b_g_ref,
                      w_fc_ref, b_fc_ref, out_ref):
    # feature_embedding: (TB, D) @ (D, H) + (1, H)
    h = (jnp.dot(x_ref[...], w_emb_ref[...],
                 preferred_element_type=jnp.float32) + b_emb_ref[...])

    # 4-layer LSTM, seq_len == 1, h0 = c0 = 0.
    # f-gate and every h_prev / c_prev term are identically zero -> dropped.
    # Gate-major weights: w_g_ref[layer, 0/1/2] = W_i / W_g / W_o, each (H, H).
    num_layers = w_g_ref.shape[0]
    for layer in range(num_layers):
        i_g = jax.nn.sigmoid(
            jnp.dot(h, w_g_ref[layer, 0], preferred_element_type=jnp.float32)
            + b_g_ref[layer, 0])
        g_g = jnp.tanh(
            jnp.dot(h, w_g_ref[layer, 1], preferred_element_type=jnp.float32)
            + b_g_ref[layer, 1])
        o_g = jax.nn.sigmoid(
            jnp.dot(h, w_g_ref[layer, 2], preferred_element_type=jnp.float32)
            + b_g_ref[layer, 2])
        h = o_g * jnp.tanh(i_g * g_g)          # input to the next layer

    # x[:, -1, :] is just h (seq_len == 1); fc_out (lane-padded to 128) + sigmoid.
    out_ref[...] = jax.nn.sigmoid(
        jnp.dot(h, w_fc_ref[...], preferred_element_type=jnp.float32)
        + b_fc_ref[...])


# --------------------------------------------------------------------------- #
# Wrapper
# --------------------------------------------------------------------------- #
def lstm_model_forward(x, packed, *, block_b=128):
    B, D = x.shape
    H = packed["w_emb"].shape[1]
    L = packed["w_g"].shape[0]
    out_pad = packed["w_fc"].shape[1]
    out_dim = packed["out_dim"]

    # Pad batch to a multiple of 8 (f32 sublane height); tile it if large.
    bb = min(block_b, _round_up(B, 8))
    B_pad = _round_up(B, bb)
    if B_pad != B:
        x_pad = jnp.zeros((B_pad, D), x.dtype).at[:B].set(x)
    else:
        x_pad = x

    cost = pl.CostEstimate(
        flops=2 * B_pad * (D * H + L * 3 * H * H + H * out_pad),
        transcendentals=B_pad * (L * 4 * H + out_pad),
        bytes_accessed=4 * (B_pad * D + D * H + H + L * 3 * H * H + L * 3 * H
                            + H * out_pad + out_pad + B_pad * out_pad),
    )

    out = pl.pallas_call(
        lstm_model_kernel,
        out_shape=jax.ShapeDtypeStruct((B_pad, out_pad), jnp.float32),
        grid=(B_pad // bb,),
        in_specs=[
            pl.BlockSpec((bb, D), lambda i: (i, 0)),            # x batch tile
            pl.BlockSpec((D, H), lambda i: (0, 0)),             # w_emb
            pl.BlockSpec((1, H), lambda i: (0, 0)),             # b_emb
            pl.BlockSpec((L, 3, H, H), lambda i: (0, 0, 0, 0)),  # gate-major W_ih
            pl.BlockSpec((L, 3, 1, H), lambda i: (0, 0, 0, 0)),  # fused b_ih + b_hh
            pl.BlockSpec((H, out_pad), lambda i: (0, 0)),       # w_fc (lane-padded)
            pl.BlockSpec((1, out_pad), lambda i: (0, 0)),       # b_fc (lane-padded)
        ],
        out_specs=pl.BlockSpec((bb, out_pad), lambda i: (i, 0)),
        compiler_params=pltpu.CompilerParams(
            dimension_semantics=("parallel",)),
        cost_estimate=cost,
    )(x_pad, packed["w_emb"], packed["b_emb"], packed["w_g"], packed["b_g"],
      packed["w_fc"], packed["b_fc"])

    # Drop batch padding and lane padding, then squeeze (matches torch .squeeze()).
    return jnp.squeeze(out[:B, :out_dim])


# --------------------------------------------------------------------------- #
# Parameter construction (PyTorch-style) and packing for the kernel
# --------------------------------------------------------------------------- #
def init_torch_style_params(key, input_dim, hidden_dim, output_dim, num_layers):
    """PyTorch-layout params with U(-1/sqrt(fan), 1/sqrt(fan)) init."""
    u = lambda k, shape, bound: jax.random.uniform(
        k, shape, jnp.float32, -bound, bound)
    keys = iter(jax.random.split(key, 4 + 4 * num_layers))
    eb = input_dim ** -0.5
    hb = hidden_dim ** -0.5
    p = {
        "emb.weight": u(next(keys), (hidden_dim, input_dim), eb),
        "emb.bias":   u(next(keys), (hidden_dim,), eb),
        "fc.weight":  u(next(keys), (output_dim, hidden_dim), hb),
        "fc.bias":    u(next(keys), (output_dim,), hb),
    }
    for l in range(num_layers):
        p[f"lstm.weight_ih_l{l}"] = u(next(keys), (4 * hidden_dim, hidden_dim), hb)
        p[f"lstm.weight_hh_l{l}"] = u(next(keys), (4 * hidden_dim, hidden_dim), hb)
        p[f"lstm.bias_ih_l{l}"] = u(next(keys), (4 * hidden_dim,), hb)
        p[f"lstm.bias_hh_l{l}"] = u(next(keys), (4 * hidden_dim,), hb)
    return p


def pack_params(tp, num_layers):
    """PyTorch layout -> kernel layout.

    Drops W_hh (h0 == 0) and the f-gate (c0 == 0), fuses b_ih + b_hh, transposes
    everything to (in, out), and lane-pads fc_out to 128 columns.
    """
    H = tp["emb.bias"].shape[0]
    out_dim = tp["fc.bias"].shape[0]
    out_pad = _round_up(out_dim, 128)
    gates = (0, 2, 3)  # PyTorch order i, f, g, o -> keep i, g, o

    w_g, b_g = [], []
    for l in range(num_layers):
        W = tp[f"lstm.weight_ih_l{l}"]                           # (4H, H)
        b = tp[f"lstm.bias_ih_l{l}"] + tp[f"lstm.bias_hh_l{l}"]  # fused, (4H,)
        w_g.append(jnp.stack([W[g * H:(g + 1) * H].T for g in gates]))       # (3,H,H)
        b_g.append(jnp.stack([b[g * H:(g + 1) * H][None, :] for g in gates]))  # (3,1,H)

    w_fc = jnp.zeros((H, out_pad), jnp.float32).at[:, :out_dim].set(tp["fc.weight"].T)
    b_fc = jnp.zeros((1, out_pad), jnp.float32).at[:, :out_dim].set(tp["fc.bias"][None, :])

    return {
        "w_emb": tp["emb.weight"].T,          # (D, H)
        "b_emb": tp["emb.bias"][None, :],     # (1, H)
        "w_g": jnp.stack(w_g),                # (L, 3, H, H)
        "b_g": jnp.stack(b_g),                # (L, 3, 1, H)
        "w_fc": w_fc,                         # (H, 128)
        "b_fc": b_fc,                         # (1, 128)
        "out_dim": out_dim,                   # python int
    }


def reference_forward(x, tp, num_layers):
    """Pure-JAX reference with the FULL LSTM math (W_hh, f-gate, c_prev)."""
    H = tp["emb.bias"].shape[0]
    h = x @ tp["emb.weight"].T + tp["emb.bias"]
    for l in range(num_layers):
        h_prev = jnp.zeros_like(h)
        c_prev = jnp.zeros_like(h)
        gates = (h @ tp[f"lstm.weight_ih_l{l}"].T + tp[f"lstm.bias_ih_l{l}"]
                 + h_prev @ tp[f"lstm.weight_hh_l{l}"].T + tp[f"lstm.bias_hh_l{l}"])
        i = jax.nn.sigmoid(gates[:, 0:H])
        f = jax.nn.sigmoid(gates[:, H:2 * H])
        g = jnp.tanh(gates[:, 2 * H:3 * H])
        o = jax.nn.sigmoid(gates[:, 3 * H:4 * H])
        c = f * c_prev + i * g
        h = o * jnp.tanh(c)
    y = jax.nn.sigmoid(h @ tp["fc.weight"].T + tp["fc.bias"])
    return jnp.squeeze(y)


# --------------------------------------------------------------------------- #
if __name__ == "__main__":
    B, INPUT_DIM, HIDDEN_DIM, OUTPUT_DIM, NUM_LAYERS = 2, 16, 32, 1, 4

    key = jax.random.PRNGKey(0)
    k_params, k_x = jax.random.split(key)
    torch_params = init_torch_style_params(
        k_params, INPUT_DIM, HIDDEN_DIM, OUTPUT_DIM, NUM_LAYERS)
    packed = pack_params(torch_params, NUM_LAYERS)
    x = jax.random.normal(k_x, (B, INPUT_DIM), jnp.float32)

    y = lstm_model_forward(x, packed)
    jax.block_until_ready(y)
    assert y.shape == (B,)  # output_dim=1 squeezed away (matches torch .squeeze())

    # Sanity check against the full (un-pruned) LSTM math.
    y_ref = reference_forward(x, torch_params, NUM_LAYERS)
    assert jnp.allclose(y, y_ref, atol=1e-2), (y, y_ref)

    print("KERNEL_OK")
</pallas_src>

<mosaic_0001>
module attributes {stable_mosaic.version = 11 : i64} {
  func.func @lstm_model_kernel(%arg0: i32, %arg1: memref<8x16xf32, #tpu.memory_space<vmem>>, %arg2: memref<16x32xf32, #tpu.memory_space<vmem>>, %arg3: memref<1x32xf32, #tpu.memory_space<vmem>>, %arg4: memref<4x3x32x32xf32, #tpu.memory_space<vmem>>, %arg5: memref<4x3x1x32xf32, #tpu.memory_space<vmem>>, %arg6: memref<32x128xf32, #tpu.memory_space<vmem>>, %arg7: memref<1x128xf32, #tpu.memory_space<vmem>>, %arg8: memref<8x128xf32, #tpu.memory_space<vmem>>) attributes {dimension_semantics = [#tpu.dimension_semantics<parallel>], iteration_bounds = array<i64: 1>, scalar_prefetch = 0 : i64, scratch_operands = 0 : i64, tpu.core_type = #tpu.core_type<tc>, window_params = [{transform_indices = @transform_0, window_bounds = array<i64: 8, 16>}, {pipeline_mode = #tpu.pipeline_mode<synchronous>, transform_indices = @transform_1, window_bounds = array<i64: 16, 32>}, {pipeline_mode = #tpu.pipeline_mode<synchronous>, transform_indices = @transform_2, window_bounds = array<i64: 1, 32>}, {pipeline_mode = #tpu.pipeline_mode<synchronous>, transform_indices = @transform_3, window_bounds = array<i64: 4, 3, 32, 32>}, {pipeline_mode = #tpu.pipeline_mode<synchronous>, transform_indices = @transform_4, window_bounds = array<i64: 4, 3, 1, 32>}, {pipeline_mode = #tpu.pipeline_mode<synchronous>, transform_indices = @transform_5, window_bounds = array<i64: 32, 128>}, {pipeline_mode = #tpu.pipeline_mode<synchronous>, transform_indices = @transform_6, window_bounds = array<i64: 1, 128>}, {transform_indices = @transform_7, window_bounds = array<i64: 8, 128>}]} {
    %c0 = arith.constant 0 : index
    %c0_0 = arith.constant 0 : index
    %0 = vector.load %arg1[%c0, %c0_0] : memref<8x16xf32, #tpu.memory_space<vmem>>, vector<8x16xf32>
    %c0_1 = arith.constant 0 : index
    %c0_2 = arith.constant 0 : index
    %1 = vector.load %arg2[%c0_1, %c0_2] : memref<16x32xf32, #tpu.memory_space<vmem>>, vector<16x32xf32>
    %cst = arith.constant dense<0.000000e+00> : vector<8x32xf32>
    %2 = tpu.matmul %0, %1, %cst {dimension_numbers = #tpu.dot_dimension_numbers<[1], [0], [0], [1], [0, 0, 1, 1], [], []>} : vector<8x16xf32>, vector<16x32xf32>, vector<8x32xf32> -> vector<8x32xf32>
    %c0_3 = arith.constant 0 : index
    %c0_4 = arith.constant 0 : index
    %3 = vector.load %arg3[%c0_3, %c0_4] : memref<1x32xf32, #tpu.memory_space<vmem>>, vector<1x32xf32>
    %4 = vector.broadcast %3 : vector<1x32xf32> to vector<8x32xf32>
    %5 = arith.addf %2, %4 : vector<8x32xf32>
    %c0_5 = arith.constant 0 : index
    %c0_6 = arith.constant 0 : index
    %c0_7 = arith.constant 0 : index
    %c0_8 = arith.constant 0 : index
    %6 = vector.load %arg4[%c0_5, %c0_6, %c0_7, %c0_8] : memref<4x3x32x32xf32, #tpu.memory_space<vmem>>, vector<1x1x32x32xf32>
    %7 = vector.shape_cast %6 : vector<1x1x32x32xf32> to vector<32x32xf32>
    %cst_9 = arith.constant dense<0.000000e+00> : vector<8x32xf32>
    %8 = tpu.matmul %5, %7, %cst_9 {dimension_numbers = #tpu.dot_dimension_numbers<[1], [0], [0], [1], [0, 0, 1, 1], [], []>} : vector<8x32xf32>, vector<32x32xf32>, vector<8x32xf32> -> vector<8x32xf32>
    %c0_10 = arith.constant 0 : index
    %c0_11 = arith.constant 0 : index
    %c0_12 = arith.constant 0 : index
    %c0_13 = arith.constant 0 : index
    %9 = vector.load %arg5[%c0_10, %c0_11, %c0_12, %c0_13] : memref<4x3x1x32xf32, #tpu.memory_space<vmem>>, vector<1x1x1x32xf32>
    %10 = vector.shape_cast %9 : vector<1x1x1x32xf32> to vector<1x32xf32>
    %11 = vector.broadcast %10 : vector<1x32xf32> to vector<8x32xf32>
    %12 = arith.addf %8, %11 : vector<8x32xf32>
    %13 = arith.negf %12 : vector<8x32xf32>
    %14 = math.exp %13 : vector<8x32xf32>
    %cst_14 = arith.constant 1.000000e+00 : f32
    %15 = vector.broadcast %cst_14 : f32 to vector<8x32xf32>
    %16 = arith.addf %15, %14 : vector<8x32xf32>
    %17 = arith.divf %15, %16 : vector<8x32xf32>
    %c0_15 = arith.constant 0 : index
    %c1 = arith.constant 1 : index
    %c0_16 = arith.constant 0 : index
    %c0_17 = arith.constant 0 : index
    %18 = vector.load %arg4[%c0_15, %c1, %c0_16, %c0_17] : memref<4x3x32x32xf32, #tpu.memory_space<vmem>>, vector<1x1x32x32xf32>
    %19 = vector.shape_cast %18 : vector<1x1x32x32xf32> to vector<32x32xf32>
    %cst_18 = arith.constant dense<0.000000e+00> : vector<8x32xf32>
    %20 = tpu.matmul %5, %19, %cst_18 {dimension_numbers = #tpu.dot_dimension_numbers<[1], [0], [0], [1], [0, 0, 1, 1], [], []>} : vector<8x32xf32>, vector<32x32xf32>, vector<8x32xf32> -> vector<8x32xf32>
    %c0_19 = arith.constant 0 : index
    %c1_20 = arith.constant 1 : index
    %c0_21 = arith.constant 0 : index
    %c0_22 = arith.constant 0 : index
    %21 = vector.load %arg5[%c0_19, %c1_20, %c0_21, %c0_22] : memref<4x3x1x32xf32, #tpu.memory_space<vmem>>, vector<1x1x1x32xf32>
    %22 = vector.shape_cast %21 : vector<1x1x1x32xf32> to vector<1x32xf32>
    %23 = vector.broadcast %22 : vector<1x32xf32> to vector<8x32xf32>
    %24 = arith.addf %20, %23 : vector<8x32xf32>
    %25 = math.tanh %24 : vector<8x32xf32>
    %c0_23 = arith.constant 0 : index
    %c2 = arith.constant 2 : index
    %c0_24 = arith.constant 0 : index
    %c0_25 = arith.constant 0 : index
    %26 = vector.load %arg4[%c0_23, %c2, %c0_24, %c0_25] : memref<4x3x32x32xf32, #tpu.memory_space<vmem>>, vector<1x1x32x32xf32>
    %27 = vector.shape_cast %26 : vector<1x1x32x32xf32> to vector<32x32xf32>
    %cst_26 = arith.constant dense<0.000000e+00> : vector<8x32xf32>
    %28 = tpu.matmul %5, %27, %cst_26 {dimension_numbers = #tpu.dot_dimension_numbers<[1], [0], [0], [1], [0, 0, 1, 1], [], []>} : vector<8x32xf32>, vector<32x32xf32>, vector<8x32xf32> -> vector<8x32xf32>
    %c0_27 = arith.constant 0 : index
    %c2_28 = arith.constant 2 : index
    %c0_29 = arith.constant 0 : index
    %c0_30 = arith.constant 0 : index
    %29 = vector.load %arg5[%c0_27, %c2_28, %c0_29, %c0_30] : memref<4x3x1x32xf32, #tpu.memory_space<vmem>>, vector<1x1x1x32xf32>
    %30 = vector.shape_cast %29 : vector<1x1x1x32xf32> to vector<1x32xf32>
    %31 = vector.broadcast %30 : vector<1x32xf32> to vector<8x32xf32>
    %32 = arith.addf %28, %31 : vector<8x32xf32>
    %33 = arith.negf %32 : vector<8x32xf32>
    %34 = math.exp %33 : vector<8x32xf32>
    %cst_31 = arith.constant 1.000000e+00 : f32
    %35 = vector.broadcast %cst_31 : f32 to vector<8x32xf32>
    %36 = arith.addf %35, %34 : vector<8x32xf32>
    %37 = arith.divf %35, %36 : vector<8x32xf32>
    %38 = arith.mulf %17, %25 : vector<8x32xf32>
    %39 = math.tanh %38 : vector<8x32xf32>
    %40 = arith.mulf %37, %39 : vector<8x32xf32>
    %c1_32 = arith.constant 1 : index
    %c0_33 = arith.constant 0 : index
    %c0_34 = arith.constant 0 : index
    %c0_35 = arith.constant 0 : index
    %41 = vector.load %arg4[%c1_32, %c0_33, %c0_34, %c0_35] : memref<4x3x32x32xf32, #tpu.memory_space<vmem>>, vector<1x1x32x32xf32>
    %42 = vector.shape_cast %41 : vector<1x1x32x32xf32> to vector<32x32xf32>
    %cst_36 = arith.constant dense<0.000000e+00> : vector<8x32xf32>
    %43 = tpu.matmul %40, %42, %cst_36 {dimension_numbers = #tpu.dot_dimension_numbers<[1], [0], [0], [1], [0, 0, 1, 1], [], []>} : vector<8x32xf32>, vector<32x32xf32>, vector<8x32xf32> -> vector<8x32xf32>
    %c1_37 = arith.constant 1 : index
    %c0_38 = arith.constant 0 : index
    %c0_39 = arith.constant 0 : index
    %c0_40 = arith.constant 0 : index
    %44 = vector.load %arg5[%c1_37, %c0_38, %c0_39, %c0_40] : memref<4x3x1x32xf32, #tpu.memory_space<vmem>>, vector<1x1x1x32xf32>
    %45 = vector.shape_cast %44 : vector<1x1x1x32xf32> to vector<1x32xf32>
    %46 = vector.broadcast %45 : vector<1x32xf32> to vector<8x32xf32>
    %47 = arith.addf %43, %46 : vector<8x32xf32>
    %48 = arith.negf %47 : vector<8x32xf32>
    %49 = math.exp %48 : vector<8x32xf32>
    %cst_41 = arith.constant 1.000000e+00 : f32
    %50 = vector.broadcast %cst_41 : f32 to vector<8x32xf32>
    %51 = arith.addf %50, %49 : vector<8x32xf32>
    %52 = arith.divf %50, %51 : vector<8x32xf32>
    %c1_42 = arith.constant 1 : index
    %c1_43 = arith.constant 1 : index
    %c0_44 = arith.constant 0 : index
    %c0_45 = arith.constant 0 : index
    %53 = vector.load %arg4[%c1_42, %c1_43, %c0_44, %c0_45] : memref<4x3x32x32xf32, #tpu.memory_space<vmem>>, vector<1x1x32x32xf32>
    %54 = vector.shape_cast %53 : vector<1x1x32x32xf32> to vector<32x32xf32>
    %cst_46 = arith.constant dense<0.000000e+00> : vector<8x32xf32>
    %55 = tpu.matmul %40, %54, %cst_46 {dimension_numbers = #tpu.dot_dimension_numbers<[1], [0], [0], [1], [0, 0, 1, 1], [], []>} : vector<8x32xf32>, vector<32x32xf32>, vector<8x32xf32> -> vector<8x32xf32>
    %c1_47 = arith.constant 1 : index
    %c1_48 = arith.constant 1 : index
    %c0_49 = arith.constant 0 : index
    %c0_50 = arith.constant 0 : index
    %56 = vector.load %arg5[%c1_47, %c1_48, %c0_49, %c0_50] : memref<4x3x1x32xf32, #tpu.memory_space<vmem>>, vector<1x1x1x32xf32>
    %57 = vector.shape_cast %56 : vector<1x1x1x32xf32> to vector<1x32xf32>
    %58 = vector.broadcast %57 : vector<1x32xf32> to vector<8x32xf32>
    %59 = arith.addf %55, %58 : vector<8x32xf32>
    %60 = math.tanh %59 : vector<8x32xf32>
    %c1_51 = arith.constant 1 : index
    %c2_52 = arith.constant 2 : index
    %c0_53 = arith.constant 0 : index
    %c0_54 = arith.constant 0 : index
    %61 = vector.load %arg4[%c1_51, %c2_52, %c0_53, %c0_54] : memref<4x3x32x32xf32, #tpu.memory_space<vmem>>, vector<1x1x32x32xf32>
    %62 = vector.shape_cast %61 : vector<1x1x32x32xf32> to vector<32x32xf32>
    %cst_55 = arith.constant dense<0.000000e+00> : vector<8x32xf32>
    %63 = tpu.matmul %40, %62, %cst_55 {dimension_numbers = #tpu.dot_dimension_numbers<[1], [0], [0], [1], [0, 0, 1, 1], [], []>} : vector<8x32xf32>, vector<32x32xf32>, vector<8x32xf32> -> vector<8x32xf32>
    %c1_56 = arith.constant 1 : index
    %c2_57 = arith.constant 2 : index
    %c0_58 = arith.constant 0 : index
    %c0_59 = arith.constant 0 : index
    %64 = vector.load %arg5[%c1_56, %c2_57, %c0_58, %c0_59] : memref<4x3x1x32xf32, #tpu.memory_space<vmem>>, vector<1x1x1x32xf32>
    %65 = vector.shape_cast %64 : vector<1x1x1x32xf32> to vector<1x32xf32>
    %66 = vector.broadcast %65 : vector<1x32xf32> to vector<8x32xf32>
    %67 = arith.addf %63, %66 : vector<8x32xf32>
    %68 = arith.negf %67 : vector<8x32xf32>
    %69 = math.exp %68 : vector<8x32xf32>
    %cst_60 = arith.constant 1.000000e+00 : f32
    %70 = vector.broadcast %cst_60 : f32 to vector<8x32xf32>
    %71 = arith.addf %70, %69 : vector<8x32xf32>
    %72 = arith.divf %70, %71 : vector<8x32xf32>
    %73 = arith.mulf %52, %60 : vector<8x32xf32>
    %74 = math.tanh %73 : vector<8x32xf32>
    %75 = arith.mulf %72, %74 : vector<8x32xf32>
    %c2_61 = arith.constant 2 : index
    %c0_62 = arith.constant 0 : index
    %c0_63 = arith.constant 0 : index
    %c0_64 = arith.constant 0 : index
    %76 = vector.load %arg4[%c2_61, %c0_62, %c0_63, %c0_64] : memref<4x3x32x32xf32, #tpu.memory_space<vmem>>, vector<1x1x32x32xf32>
    %77 = vector.shape_cast %76 : vector<1x1x32x32xf32> to vector<32x32xf32>
    %cst_65 = arith.constant dense<0.000000e+00> : vector<8x32xf32>
    %78 = tpu.matmul %75, %77, %cst_65 {dimension_numbers = #tpu.dot_dimension_numbers<[1], [0], [0], [1], [0, 0, 1, 1], [], []>} : vector<8x32xf32>, vector<32x32xf32>, vector<8x32xf32> -> vector<8x32xf32>
    %c2_66 = arith.constant 2 : index
    %c0_67 = arith.constant 0 : index
    %c0_68 = arith.constant 0 : index
    %c0_69 = arith.constant 0 : index
    %79 = vector.load %arg5[%c2_66, %c0_67, %c0_68, %c0_69] : memref<4x3x1x32xf32, #tpu.memory_space<vmem>>, vector<1x1x1x32xf32>
    %80 = vector.shape_cast %79 : vector<1x1x1x32xf32> to vector<1x32xf32>
    %81 = vector.broadcast %80 : vector<1x32xf32> to vector<8x32xf32>
    %82 = arith.addf %78, %81 : vector<8x32xf32>
    %83 = arith.negf %82 : vector<8x32xf32>
    %84 = math.exp %83 : vector<8x32xf32>
    %cst_70 = arith.constant 1.000000e+00 : f32
    %85 = vector.broadcast %cst_70 : f32 to vector<8x32xf32>
    %86 = arith.addf %85, %84 : vector<8x32xf32>
    %87 = arith.divf %85, %86 : vector<8x32xf32>
    %c2_71 = arith.constant 2 : index
    %c1_72 = arith.constant 1 : index
    %c0_73 = arith.constant 0 : index
    %c0_74 = arith.constant 0 : index
    %88 = vector.load %arg4[%c2_71, %c1_72, %c0_73, %c0_74] : memref<4x3x32x32xf32, #tpu.memory_space<vmem>>, vector<1x1x32x32xf32>
    %89 = vector.shape_cast %88 : vector<1x1x32x32xf32> to vector<32x32xf32>
    %cst_75 = arith.constant dense<0.000000e+00> : vector<8x32xf32>
    %90 = tpu.matmul %75, %89, %cst_75 {dimension_numbers = #tpu.dot_dimension_numbers<[1], [0], [0], [1], [0, 0, 1, 1], [], []>} : vector<8x32xf32>, vector<32x32xf32>, vector<8x32xf32> -> vector<8x32xf32>
    %c2_76 = arith.constant 2 : index
    %c1_77 = arith.constant 1 : index
    %c0_78 = arith.constant 0 : index
    %c0_79 = arith.constant 0 : index
    %91 = vector.load %arg5[%c2_76, %c1_77, %c0_78, %c0_79] : memref<4x3x1x32xf32, #tpu.memory_space<vmem>>, vector<1x1x1x32xf32>
    %92 = vector.shape_cast %91 : vector<1x1x1x32xf32> to vector<1x32xf32>
    %93 = vector.broadcast %92 : vector<1x32xf32> to vector<8x32xf32>
    %94 = arith.addf %90, %93 : vector<8x32xf32>
    %95 = math.tanh %94 : vector<8x32xf32>
    %c2_80 = arith.constant 2 : index
    %c2_81 = arith.constant 2 : index
    %c0_82 = arith.constant 0 : index
    %c0_83 = arith.constant 0 : index
    %96 = vector.load %arg4[%c2_80, %c2_81, %c0_82, %c0_83] : memref<4x3x32x32xf32, #tpu.memory_space<vmem>>, vector<1x1x32x32xf32>
    %97 = vector.shape_cast %96 : vector<1x1x32x32xf32> to vector<32x32xf32>
    %cst_84 = arith.constant dense<0.000000e+00> : vector<8x32xf32>
    %98 = tpu.matmul %75, %97, %cst_84 {dimension_numbers = #tpu.dot_dimension_numbers<[1], [0], [0], [1], [0, 0, 1, 1], [], []>} : vector<8x32xf32>, vector<32x32xf32>, vector<8x32xf32> -> vector<8x32xf32>
    %c2_85 = arith.constant 2 : index
    %c2_86 = arith.constant 2 : index
    %c0_87 = arith.constant 0 : index
    %c0_88 = arith.constant 0 : index
    %99 = vector.load %arg5[%c2_85, %c2_86, %c0_87, %c0_88] : memref<4x3x1x32xf32, #tpu.memory_space<vmem>>, vector<1x1x1x32xf32>
    %100 = vector.shape_cast %99 : vector<1x1x1x32xf32> to vector<1x32xf32>
    %101 = vector.broadcast %100 : vector<1x32xf32> to vector<8x32xf32>
    %102 = arith.addf %98, %101 : vector<8x32xf32>
    %103 = arith.negf %102 : vector<8x32xf32>
    %104 = math.exp %103 : vector<8x32xf32>
    %cst_89 = arith.constant 1.000000e+00 : f32
    %105 = vector.broadcast %cst_89 : f32 to vector<8x32xf32>
    %106 = arith.addf %105, %104 : vector<8x32xf32>
    %107 = arith.divf %105, %106 : vector<8x32xf32>
    %108 = arith.mulf %87, %95 : vector<8x32xf32>
    %109 = math.tanh %108 : vector<8x32xf32>
    %110 = arith.mulf %107, %109 : vector<8x32xf32>
    %c3 = arith.constant 3 : index
    %c0_90 = arith.constant 0 : index
    %c0_91 = arith.constant 0 : index
    %c0_92 = arith.constant 0 : index
    %111 = vector.load %arg4[%c3, %c0_90, %c0_91, %c0_92] : memref<4x3x32x32xf32, #tpu.memory_space<vmem>>, vector<1x1x32x32xf32>
    %112 = vector.shape_cast %111 : vector<1x1x32x32xf32> to vector<32x32xf32>
    %cst_93 = arith.constant dense<0.000000e+00> : vector<8x32xf32>
    %113 = tpu.matmul %110, %112, %cst_93 {dimension_numbers = #tpu.dot_dimension_numbers<[1], [0], [0], [1], [0, 0, 1, 1], [], []>} : vector<8x32xf32>, vector<32x32xf32>, vector<8x32xf32> -> vector<8x32xf32>
    %c3_94 = arith.constant 3 : index
    %c0_95 = arith.constant 0 : index
    %c0_96 = arith.constant 0 : index
    %c0_97 = arith.constant 0 : index
    %114 = vector.load %arg5[%c3_94, %c0_95, %c0_96, %c0_97] : memref<4x3x1x32xf32, #tpu.memory_space<vmem>>, vector<1x1x1x32xf32>
    %115 = vector.shape_cast %114 : vector<1x1x1x32xf32> to vector<1x32xf32>
    %116 = vector.broadcast %115 : vector<1x32xf32> to vector<8x32xf32>
    %117 = arith.addf %113, %116 : vector<8x32xf32>
    %118 = arith.negf %117 : vector<8x32xf32>
    %119 = math.exp %118 : vector<8x32xf32>
    %cst_98 = arith.constant 1.000000e+00 : f32
    %120 = vector.broadcast %cst_98 : f32 to vector<8x32xf32>
    %121 = arith.addf %120, %119 : vector<8x32xf32>
    %122 = arith.divf %120, %121 : vector<8x32xf32>
    %c3_99 = arith.constant 3 : index
    %c1_100 = arith.constant 1 : index
    %c0_101 = arith.constant 0 : index
    %c0_102 = arith.constant 0 : index
    %123 = vector.load %arg4[%c3_99, %c1_100, %c0_101, %c0_102] : memref<4x3x32x32xf32, #tpu.memory_space<vmem>>, vector<1x1x32x32xf32>
    %124 = vector.shape_cast %123 : vector<1x1x32x32xf32> to vector<32x32xf32>
    %cst_103 = arith.constant dense<0.000000e+00> : vector<8x32xf32>
    %125 = tpu.matmul %110, %124, %cst_103 {dimension_numbers = #tpu.dot_dimension_numbers<[1], [0], [0], [1], [0, 0, 1, 1], [], []>} : vector<8x32xf32>, vector<32x32xf32>, vector<8x32xf32> -> vector<8x32xf32>
    %c3_104 = arith.constant 3 : index
    %c1_105 = arith.constant 1 : index
    %c0_106 = arith.constant 0 : index
    %c0_107 = arith.constant 0 : index
    %126 = vector.load %arg5[%c3_104, %c1_105, %c0_106, %c0_107] : memref<4x3x1x32xf32, #tpu.memory_space<vmem>>, vector<1x1x1x32xf32>
    %127 = vector.shape_cast %126 : vector<1x1x1x32xf32> to vector<1x32xf32>
    %128 = vector.broadcast %127 : vector<1x32xf32> to vector<8x32xf32>
    %129 = arith.addf %125, %128 : vector<8x32xf32>
    %130 = math.tanh %129 : vector<8x32xf32>
    %c3_108 = arith.constant 3 : index
    %c2_109 = arith.constant 2 : index
    %c0_110 = arith.constant 0 : index
    %c0_111 = arith.constant 0 : index
    %131 = vector.load %arg4[%c3_108, %c2_109, %c0_110, %c0_111] : memref<4x3x32x32xf32, #tpu.memory_space<vmem>>, vector<1x1x32x32xf32>
    %132 = vector.shape_cast %131 : vector<1x1x32x32xf32> to vector<32x32xf32>
    %cst_112 = arith.constant dense<0.000000e+00> : vector<8x32xf32>
    %133 = tpu.matmul %110, %132, %cst_112 {dimension_numbers = #tpu.dot_dimension_numbers<[1], [0], [0], [1], [0, 0, 1, 1], [], []>} : vector<8x32xf32>, vector<32x32xf32>, vector<8x32xf32> -> vector<8x32xf32>
    %c3_113 = arith.constant 3 : index
    %c2_114 = arith.constant 2 : index
    %c0_115 = arith.constant 0 : index
    %c0_116 = arith.constant 0 : index
    %134 = vector.load %arg5[%c3_113, %c2_114, %c0_115, %c0_116] : memref<4x3x1x32xf32, #tpu.memory_space<vmem>>, vector<1x1x1x32xf32>
    %135 = vector.shape_cast %134 : vector<1x1x1x32xf32> to vector<1x32xf32>
    %136 = vector.broadcast %135 : vector<1x32xf32> to vector<8x32xf32>
    %137 = arith.addf %133, %136 : vector<8x32xf32>
    %138 = arith.negf %137 : vector<8x32xf32>
    %139 = math.exp %138 : vector<8x32xf32>
    %cst_117 = arith.constant 1.000000e+00 : f32
    %140 = vector.broadcast %cst_117 : f32 to vector<8x32xf32>
    %141 = arith.addf %140, %139 : vector<8x32xf32>
    %142 = arith.divf %140, %141 : vector<8x32xf32>
    %143 = arith.mulf %122, %130 : vector<8x32xf32>
    %144 = math.tanh %143 : vector<8x32xf32>
    %145 = arith.mulf %142, %144 : vector<8x32xf32>
    %c0_118 = arith.constant 0 : index
    %c0_119 = arith.constant 0 : index
    %146 = vector.load %arg6[%c0_118, %c0_119] : memref<32x128xf32, #tpu.memory_space<vmem>>, vector<32x128xf32>
    %cst_120 = arith.constant dense<0.000000e+00> : vector<8x128xf32>
    %147 = tpu.matmul %145, %146, %cst_120 {dimension_numbers = #tpu.dot_dimension_numbers<[1], [0], [0], [1], [0, 0, 1, 1], [], []>} : vector<8x32xf32>, vector<32x128xf32>, vector<8x128xf32> -> vector<8x128xf32>
    %c0_121 = arith.constant 0 : index
    %c0_122 = arith.constant 0 : index
    %148 = vector.load %arg7[%c0_121, %c0_122] : memref<1x128xf32, #tpu.memory_space<vmem>>, vector<1x128xf32>
    %149 = vector.broadcast %148 : vector<1x128xf32> to vector<8x128xf32>
    %150 = arith.addf %147, %149 : vector<8x128xf32>
    %151 = arith.negf %150 : vector<8x128xf32>
    %152 = math.exp %151 : vector<8x128xf32>
    %cst_123 = arith.constant 1.000000e+00 : f32
    %153 = vector.broadcast %cst_123 : f32 to vector<8x128xf32>
    %154 = arith.addf %153, %152 : vector<8x128xf32>
    %155 = arith.divf %153, %154 : vector<8x128xf32>
    %c0_124 = arith.constant 0 : index
    %c0_125 = arith.constant 0 : index
    %156 = vector.load %arg8[%c0_124, %c0_125] : memref<8x128xf32, #tpu.memory_space<vmem>>, vector<8x128xf32>
    tpu.vector_store %arg8[%c0_124, %c0_125], %155 {strides = array<i32>} : memref<8x128xf32, #tpu.memory_space<vmem>>, vector<8x128xf32>,
    return
  }
  func.func @transform_0(%arg0: i32) -> (i32, i32) {
    %c0_i32 = arith.constant 0 : i32
    %c0_i32_0 = arith.constant 0 : i32
    return %arg0, %c0_i32 : i32, i32
  }
  func.func @transform_1(%arg0: i32) -> (i32, i32) {
    %c0_i32 = arith.constant 0 : i32
    %c0_i32_0 = arith.constant 0 : i32
    %c0_i32_1 = arith.constant 0 : i32
    return %c0_i32, %c0_i32_0 : i32, i32
  }
  func.func @transform_2(%arg0: i32) -> (i32, i32) {
    %c0_i32 = arith.constant 0 : i32
    %c0_i32_0 = arith.constant 0 : i32
    %c0_i32_1 = arith.constant 0 : i32
    return %c0_i32, %c0_i32_0 : i32, i32
  }
  func.func @transform_3(%arg0: i32) -> (i32, i32, i32, i32) {
    %c0_i32 = arith.constant 0 : i32
    %c0_i32_0 = arith.constant 0 : i32
    %c0_i32_1 = arith.constant 0 : i32
    %c0_i32_2 = arith.constant 0 : i32
    %c0_i32_3 = arith.constant 0 : i32
    return %c0_i32, %c0_i32_0, %c0_i32_1, %c0_i32_2 : i32, i32, i32, i32
  }
  func.func @transform_4(%arg0: i32) -> (i32, i32, i32, i32) {
    %c0_i32 = arith.constant 0 : i32
    %c0_i32_0 = arith.constant 0 : i32
    %c0_i32_1 = arith.constant 0 : i32
    %c0_i32_2 = arith.constant 0 : i32
    %c0_i32_3 = arith.constant 0 : i32
    return %c0_i32, %c0_i32_0, %c0_i32_1, %c0_i32_2 : i32, i32, i32, i32
  }
  func.func @transform_5(%arg0: i32) -> (i32, i32) {
    %c0_i32 = arith.constant 0 : i32
    %c0_i32_0 = arith.constant 0 : i32
    %c0_i32_1 = arith.constant 0 : i32
    return %c0_i32, %c0_i32_0 : i32, i32
  }
  func.func @transform_6(%arg0: i32) -> (i32, i32) {
    %c0_i32 = arith.constant 0 : i32
    %c0_i32_0 = arith.constant 0 : i32
    %c0_i32_1 = arith.constant 0 : i32
    return %c0_i32, %c0_i32_0 : i32, i32
  }
  func.func @transform_7(%arg0: i32) -> (i32, i32) {
    %c0_i32 = arith.constant 0 : i32
    %c0_i32_0 = arith.constant 0 : i32
    return %arg0, %c0_i32 : i32, i32
  }
}

</mosaic_0001>

<bundles_post_ra>
// kernel: tpu_custom_call.1
= control target key start
LH: loop header
LB: loop body
LE: loop exit
PB: predicated region body
PF: predicated region fallthrough
CT: control target
= control target key end

     0   :  { %12 = vsyncpa [#allocation3], 0  ;;  %s2099_s0 = inlined_call_operand.hbm [shape: f32[8,16], index: 0, kind: input, shape index: {}]   ;;  %s2100_s1 = inlined_call_operand.hbm [shape: f32[16,32], index: 1, kind: input, shape index: {}]   ;;  %s2101_s2 = inlined_call_operand.vmem [shape: f32[1,32], index: 2, kind: input, shape index: {}]   ;;  %s2102_s3 = inlined_call_operand.hbm [shape: f32[4,3,32,32], index: 3, kind: input, shape index: {}]   ;;  %s2103_s4 = inlined_call_operand.vmem [shape: f32[4,3,1,32], index: 4, kind: input, shape index: {}]   ;;  %s2104_s5 = inlined_call_operand.hbm [shape: f32[32,128], index: 5, kind: input, shape index: {}]   ;;  %s2105_s6 = inlined_call_operand.vmem [shape: f32[1,128], index: 6, kind: input, shape index: {}]   ;;  %s2106_s7 = inlined_call_operand.hbm [shape: f32[8,128], index: 7, kind: output, shape index: {}]  }
   0x1   :  { %13 = vsyncpa [#allocation6], 0 }
   0x2   :  { %14 = vsyncpa [#allocation9], 0 }
   0x3   :  { %15 = vsyncpa [#allocation4], 0  ;;  %s1870_s24 = smov [#allocation5]   ;;  %s1752_s28 = scalar_lea.hbm %s2100_s1, 256 }
   0x4   :  { %s31_s25 = sshll.u32 %s1870_s24, 4  ;;  %p1753_p0 = scmp.ne.s32.totalorder %s2100_s1, %s1752_s28  ;;  %s32_s25 = int_to_ptr.vmem [resolvable:$true] %s31_s25 }
   0x5   :  { %p1756_p1 = scmp.lt.u32.totalorder %s1752_s28, %s2100_s1 }
   0x7   :  { %p1758_p2 = pnand %p1756_p1, %p1753_p0 }
   0x9   :  { %1761 = shalt.err (!%p1758_p2)
}
   0xa   :  { %s1762_s10 = scalar_lea.vmem %s32_s25, 256  ;;  %p1767_p4 = scmp.lt.s32.totalorder %s32_s25, %s32_s25 }
   0xb   :  { %p1763_p3 = scmp.ne.s32.totalorder %s32_s25, %s1762_s10  ;;  %p1768_p5 = scmp.lt.s32.totalorder %s1762_s10, %s1762_s10 }
   0xd   :  { %p1769_p6 = por %p1768_p5, %p1767_p4 }
   0xf   :  { %p1770_p7 = pnand %p1769_p6, %p1763_p3 }
  0x11   :  { %1773 = shalt.err (!%p1770_p7)
}
  0x12   :  { %s1871_s11 = smov 128   ;;  %s1872_s12 = smov 8  }
  0x13   :  { %37 = dma.hbm_to_vmem [thread:$0]  %s2100_s1, 256, %s32_s25, [#allocation6], %s1871_s11, %s1871_s11, %s1872_s12  }
  0x14   :  { %s1873_s15 = smov [#allocation2]   ;;  %s1874_s17 = smov [#allocation7]  }
  0x15   :  { %s22_s16 = sshll.u32 %s1873_s15, 4  ;;  %s45_s18 = sshll.u32 %s1874_s17, 4  ;;  %s23_s16 = int_to_ptr.vmem [resolvable:$true] %s22_s16  ;;  %s46_s18 = int_to_ptr.vmem [resolvable:$true] %s45_s18 }
  0x16   :  { %s1774_s21 = scalar_lea.hbm %s2099_s0, 128 }
  0x17   :  { %p1775_p8 = scmp.ne.s32.totalorder %s2099_s0, %s1774_s21  ;;  %p1778_p9 = scmp.lt.u32.totalorder %s1774_s21, %s2099_s0 }
  0x19   :  { %p1780_p10 = pnand %p1778_p9, %p1775_p8 }
  0x1b   :  { %1783 = shalt.err (!%p1780_p10)
}
  0x1c   :  { %s1784_s1 = scalar_lea.vmem %s23_s16, 128  ;;  %p1789_p12 = scmp.lt.s32.totalorder %s23_s16, %s23_s16 }
  0x1d   :  { %p1785_p11 = scmp.ne.s32.totalorder %s23_s16, %s1784_s1  ;;  %p1790_p13 = scmp.lt.s32.totalorder %s1784_s1, %s1784_s1 }
  0x1f   :  { %p1791_p0 = por %p1790_p13, %p1789_p12 }
  0x21   :  { %p1792_p1 = pnand %p1791_p0, %p1785_p11 }
  0x23   :  { %1795 = shalt.err (!%p1792_p1)
}
  0x24   :  { %25 = dma.hbm_to_vmem [thread:$0]  %s2099_s0, 128, %s23_s16, [#allocation3]  }
  0x25   :  { %s1796_s30 = scalar_lea.hbm %s2102_s3, 6144 }
  0x26   :  { %p1797_p2 = scmp.ne.s32.totalorder %s2102_s3, %s1796_s30  ;;  %p1800_p3 = scmp.lt.u32.totalorder %s1796_s30, %s2102_s3 }
  0x28   :  { %p1802_p4 = pnand %p1800_p3, %p1797_p2 }
  0x2a   :  { %1805 = shalt.err (!%p1802_p4)
}
  0x2b   :  { %s1806_s14 = scalar_lea.vmem %s46_s18, 6144  ;;  %p1811_p6 = scmp.lt.s32.totalorder %s46_s18, %s46_s18 }
  0x2c   :  { %p1807_p5 = scmp.ne.s32.totalorder %s46_s18, %s1806_s14  ;;  %p1812_p7 = scmp.lt.s32.totalorder %s1806_s14, %s1806_s14 }
  0x2e   :  { %p1813_p8 = por %p1812_p7, %p1811_p6 }
  0x30   :  { %p1814_p9 = pnand %p1813_p8, %p1807_p5 }
  0x32   :  { %1817 = shalt.err (!%p1814_p9)
}
  0x33   :  { %51 = dma.hbm_to_vmem [thread:$0]  %s2102_s3, 6144, %s46_s18, [#allocation6], %s1871_s11, %s1871_s11, %s1872_s12  }
  0x34   :  { %s1875_s16 = smov [#allocation8]   ;;  %s1818_s21 = scalar_lea.hbm %s2104_s5, 512 }
  0x35   :  { %s59_s17 = sshll.u32 %s1875_s16, 4  ;;  %p1819_p10 = scmp.ne.s32.totalorder %s2104_s5, %s1818_s21  ;;  %s60_s17 = int_to_ptr.vmem [resolvable:$true] %s59_s17 }
  0x36   :  { %p1822_p11 = scmp.lt.u32.totalorder %s1818_s21, %s2104_s5 }
  0x38   :  { %p1824_p12 = pnand %p1822_p11, %p1819_p10 }
  0x3a   :  { %1827 = shalt.err (!%p1824_p12)
}
  0x3b   :  { %s1828_s1 = scalar_lea.vmem %s60_s17, 512  ;;  %p1833_p0 = scmp.lt.s32.totalorder %s60_s17, %s60_s17 }
  0x3c   :  { %p1829_p13 = scmp.ne.s32.totalorder %s60_s17, %s1828_s1  ;;  %p1834_p1 = scmp.lt.s32.totalorder %s1828_s1, %s1828_s1 }
  0x3e   :  { %p1835_p2 = por %p1834_p1, %p1833_p0 }
  0x40   :  { %p1836_p3 = pnand %p1835_p2, %p1829_p13 }
  0x42   :  { %1839 = shalt.err (!%p1836_p3)
}
  0x43   :  { %65 = dma.hbm_to_vmem [thread:$0]  %s2104_s5, 512, %s60_s17, [#allocation9], %s1871_s11, %s1871_s11, %s1872_s12  }
  0x44   :  { %1862 = dma.done.wait [#allocation3], 128  }
  0x45   :  { %1863 = vsyncadd [#allocation3], 4294967168 }
  0x46   :  { %1864 = dma.done.wait [#allocation6], 6400  }
  0x47   :  { %1865 = vsyncadd [#allocation6], 4294960896 }
  0x48   :  { %1866 = dma.done.wait [#allocation9], 512  }
  0x49   :  { %1867 = vsyncadd [#allocation9], 4294966784  ;;  %v1876_v0 = vmov 0.0|0.0   ;;  %vm1877_vm0 = vmmov 0   ;;  %v1878_v1 = vmov 0.0   ;;  %v81_v2 = vld [vmem:[#allocation5] sm:$0xff] }
  0x4a   :  { %1609 = vmatprep.subr.bf16.mxu0 %v1876_v0  ;;  %1463 = vmatprep.mubr.msk.f32.mxu0 %vm1877_vm0, %v1878_v1  ;;  %v82_v3 = vld [vmem:[#allocation5 + $0x8] sm:$0xff]  ;;  %v164_v5 = vld [vmem:[#allocation7] sm:$0xff]  ;;  %v165_v6 = vld [vmem:[#allocation7 + $0x8] sm:$0xff]  ;;  %vm90_vm1 = vcmask 130048   ;;  %vm175_vm2 = vcmask 261120   ;;  %s1879_s18 = smov [#allocation10]  }
  0x4b   :  { %1612 = vmatprep.subr.bf16.mxu1 %v1876_v0  ;;  %1474 = vmatprep.mubr.msk.f32.mxu1 %vm1877_vm0, %v1878_v1  ;;  %v1610_v4 = vpack.c.bf16 %v82_v3, %v81_v2  ;;  %v256_v7 = vld [vmem:[#allocation7 + $0x20] sm:$0xff]  ;;  %v1613_v8 = vpack.c.bf16 %v165_v6, %v164_v5  ;;  %v257_v9 = vld [vmem:[#allocation7 + $0x28] sm:$0xff]  ;;  %v166_v10 = vld [vmem:[#allocation7 + $0x10] sm:$0xff]  ;;  %s1332_s5 = sshll.u32 %s1879_s18, 4  ;;  %s1333_s5 = int_to_ptr.vmem [resolvable:$true] %s1332_s5 }
  0x4c   :  { %v167_v11 = vld [vmem:[#allocation7 + $0x18] sm:$0xff]  ;;  %v80_v12 = vld [vmem:[#allocation2] sm:$0xff]  ;;  %v1619_v13 = vpack.c.bf16 %v257_v9, %v256_v7  ;;  %v258_v15 = vld [vmem:[#allocation7 + $0x30] sm:$0xff]  ;;  %s1840_s11 = scalar_lea.vmem %s1333_s5, 128  ;;  %p1845_p5 = scmp.lt.s32.totalorder %s1333_s5, %s1333_s5 }
  0x4d   :  { %1611 = vmatpush3.bf16.msra.mxu0 %v1610_v4  ;;  %1614 = vmatpush3.bf16.msra.mxu1 %v1613_v8  ;;  %v1616_v14 = vpack.c.bf16 %v167_v11, %v166_v10  ;;  %v259_v16 = vld [vmem:[#allocation7 + $0x38] sm:$0xff]  ;;  %v340_v18 = vld [vmem:[#allocation7 + $0x40] sm:$0xff]  ;;  %v341_v19 = vld [vmem:[#allocation7 + $0x48] sm:$0xff]  ;;  %p1841_p4 = scmp.ne.s32.totalorder %s1333_s5, %s1840_s11  ;;  %p1846_p6 = scmp.lt.s32.totalorder %s1840_s11, %s1840_s11 }
  0x4e   :  { %1618 = vmatprep.subr.bf16.mxu0 %v1876_v0  ;;  %1615 = vmatprep.subr.bf16.mxu1 %v1876_v0  ;;  %v1622_v17 = vpack.c.bf16 %v259_v16, %v258_v15  ;;  %v1343_v20 = vld [vmem:[%s2101_s2] ss:$0 sm:$0xff]  ;;  %v1625_v22 = vpack.c.bf16 %v341_v19, %v340_v18  ;;  %v342_v25 = vld [vmem:[#allocation7 + $0x50] sm:$0xff]  ;;  %v432_v28 = vld [vmem:[#allocation7 + $0x60] sm:$0xff] }
  0x4f   :  { %v343_v26 = vld [vmem:[#allocation7 + $0x58] sm:$0xff]  ;;  %v433_v29 = vld [vmem:[#allocation7 + $0x68] sm:$0xff]  ;;  %v524_v30 = vld [vmem:[#allocation7 + $0x80] sm:$0xff]  ;;  %p1847_p7 = por %p1846_p6, %p1845_p5 }
  0x50   :  { %1464 = vmatmul.mubr.msk.f32.vlgmr.msra.gmra.mrb[0].mxu0 %vm90_vm1, %v80_v12  ;;  %v1628_v27 = vpack.c.bf16 %v343_v26, %v342_v25  ;;  %v1631_v31 = vpack.c.bf16 %v433_v29, %v432_v28  ;;  %v525_v32 = vld [vmem:[#allocation7 + $0x88] sm:$0xff]  ;;  %v434_v33 = vld [vmem:[#allocation7 + $0x70] sm:$0xff]  ;;  %v435_v34 = vld [vmem:[#allocation7 + $0x78] sm:$0xff] }
  0x51   :  { %1620 = vmatpush3.bf16.msra.mxu0 %v1619_v13  ;;  %1485 = vmatprep.mubr.msk.f32.mxu0 %vm1877_vm0, %v1878_v1  ;;  %v1637_v35 = vpack.c.bf16 %v525_v32, %v524_v30  ;;  %v526_v36 = vld [vmem:[#allocation7 + $0x90] sm:$0xff]  ;;  %v527_v37 = vld [vmem:[#allocation7 + $0x98] sm:$0xff]  ;;  %v1634_v38 = vpack.c.bf16 %v435_v34, %v434_v33  ;;  %v608_v61 = vld [vmem:[#allocation7 + $0xa0] sm:$0xff]  ;;  %p1848_p8 = pnand %p1847_p7, %p1841_p4 }
  0x52   :  { %1617 = vmatpush3.bf16.msra.mxu1 %v1616_v14  ;;  %1621 = vmatprep.subr.bf16.mxu0 %v1876_v0  ;;  %v1640_v39 = vpack.c.bf16 %v527_v37, %v526_v36  ;;  %v1345_v40 = vld [vmem:[%s2103_s4] ss:$0 sm:$0xff]  ;;  %v1352_v47 = vld [vmem:[%s2103_s4 + $0x2] ss:$0 sm:$0xff]  ;;  %v1349_v51 = vld [vmem:[%s2103_s4 + $0x1] ss:$0 sm:$0xff] }
  0x53   :  { %1624 = vmatprep.subr.bf16.mxu1 %v1876_v0  ;;  %v609_v62 = vld [vmem:[#allocation7 + $0xa8] sm:$0xff]  ;;  %v610_v5 = vld [vmem:[#allocation7 + $0xb0] sm:$0xff]  ;;  %v611_v6 = vld [vmem:[#allocation7 + $0xb8] sm:$0xff] }
  0x54   :  { %v1643_v3 = vpack.c.bf16 %v609_v62, %v608_v61  ;;  %v1646_v7 = vpack.c.bf16 %v611_v6, %v610_v5  ;;  %v700_v8 = vld [vmem:[#allocation7 + $0xc0] sm:$0xff]  ;;  %v701_v9 = vld [vmem:[#allocation7 + $0xc8] sm:$0xff]  ;;  %v702_v13 = vld [vmem:[#allocation7 + $0xd0] sm:$0xff] }
  0x55   :  { %1623 = vmatpush3.bf16.msra.mxu0 %v1622_v17  ;;  %v792_v10 = vld [vmem:[#allocation7 + $0xe0] sm:$0xff]  ;;  %v1649_v11 = vpack.c.bf16 %v701_v9, %v700_v8  ;;  %v793_v12 = vld [vmem:[#allocation7 + $0xe8] sm:$0xff]  ;;  %v703_v14 = vld [vmem:[#allocation7 + $0xd8] sm:$0xff] }
  0x56   :  { %1630 = vmatprep.subr.bf16.mxu0 %v1876_v0  ;;  %v1655_v15 = vpack.c.bf16 %v793_v12, %v792_v10  ;;  %v794_v16 = vld [vmem:[#allocation7 + $0xf0] sm:$0xff]  ;;  %v795_v17 = vld [vmem:[#allocation7 + $0xf8] sm:$0xff]  ;;  %v1652_v18 = vpack.c.bf16 %v703_v14, %v702_v13 }
  0x57   :  { %v1658_v19 = vpack.c.bf16 %v795_v17, %v794_v16  ;;  %v1367_v62 = vld [vmem:[%s2103_s4 + $0x6] ss:$0 sm:$0xff] }
 0x123   :  { %v160_v21 = vpop.f32.mrb[0].mxu0 }
 0x124   :  { %v161_v23 = vadd.f32 %v1343_v20, %v160_v21  ;;  %v1465_v24 = vpop.f32.mrb[1].mxu0  ;;  %v1356_v20 = vld [vmem:[%s2103_s4 + $0x3] ss:$0 sm:$0xff] }
 0x126   :  { %1475 = vmatmul.mubr.msk.f32.vlgmr.msra.gmra.mrb[0].mxu1 %vm175_vm2, %v161_v23  ;;  %1486 = vmatmul.mubr.msk.f32.vlgmr.msra.gmra.mrb[2].mxu0 %vm175_vm2, %v161_v23 }
 0x127   :  { %1626 = vmatpush3.bf16.msra.mxu1 %v1625_v22  ;;  %1496 = vmatprep.mubr.msk.f32.mxu1 %vm1877_vm0, %v1878_v1 }
 0x128   :  { %1627 = vmatprep.subr.bf16.mxu1 %v1876_v0  ;;  %1507 = vmatprep.mubr.msk.f32.mxu0 %vm1877_vm0, %v1878_v1 }
 0x129   :  { %1632 = vmatpush3.bf16.msra.mxu0 %v1631_v31  ;;  %v1360_v31 = vld [vmem:[%s2103_s4 + $0x4] ss:$0 sm:$0xff] }
 0x12a   :  { %1633 = vmatprep.subr.bf16.mxu0 %v1876_v0 }
 0x12b   :  { %1629 = vmatpush3.bf16.msra.mxu1 %v1628_v27  ;;  %v1363_v27 = vld [vmem:[%s2103_s4 + $0x5] ss:$0 sm:$0xff] }
 0x12c   :  { %1636 = vmatprep.subr.bf16.mxu1 %v1876_v0 }
 0x12d   :  { %1635 = vmatpush3.bf16.msra.mxu0 %v1634_v38 }
 0x12e   :  { %1497 = vmatmul.mubr.msk.f32.vlgmr.msra.gmra.mrb[2].mxu1 %vm175_vm2, %v161_v23  ;;  %1642 = vmatprep.subr.bf16.mxu0 %v1876_v0 }
 0x12f   :  { %1518 = vmatprep.mubr.msk.f32.mxu1 %vm1877_vm0, %v1878_v1  ;;  %1638 = vmatpush3.bf16.msra.mxu1 %v1637_v35 }
 0x130   :  { %1639 = vmatprep.subr.bf16.mxu1 %v1876_v0 }
 0x133   :  { %1641 = vmatpush3.bf16.msra.mxu1 %v1640_v39 }
 0x134   :  { %1648 = vmatprep.subr.bf16.mxu1 %v1876_v0 }
 0x1f9   :  { %v245_v41 = vpop.f32.mrb[0].mxu1  ;;  %v334_v42 = vpop.f32.mrb[2].mxu0 }
 0x1fa   :  { %v246_v43 = vadd.f32 %v1345_v40, %v245_v41  ;;  %v1476_v44 = vpop.f32.mrb[1].mxu1  ;;  %v1487_v45 = vpop.f32.mrb[3].mxu0  ;;  %v335_v53 = vadd.f32 %v1349_v51, %v334_v42  ;;  %v876_v41 = vld [vmem:[#allocation7 + $0x100] sm:$0xff]  ;;  %v877_v42 = vld [vmem:[#allocation7 + $0x108] sm:$0xff] }
 0x1fb   :  { %v1661_v45 = vpack.c.bf16 %v877_v42, %v876_v41  ;;  %v969_v51 = vld [vmem:[#allocation7 + $0x128] sm:$0xff]  ;;  %v1385_v42 = vld [vmem:[%s2103_s4 + $0xb] ss:$0 sm:$0xff] }
 0x1fc   :  { %v1347_v46 = vmul.f32 -1.442695, %v246_v43 }
 0x1fe   :  { %1700 = vpow2.f32 %v1347_v46 }
 0x201   :  { %v418_v48 = vpop.f32.mrb[2].mxu1 }
 0x202   :  { %v419_v49 = vadd.f32 %v1352_v47, %v418_v48  ;;  %v1498_v50 = vpop.f32.mrb[3].mxu1  ;;  %v878_v47 = vld [vmem:[#allocation7 + $0x110] sm:$0xff]  ;;  %v879_v48 = vld [vmem:[#allocation7 + $0x118] sm:$0xff] }
 0x203   :  { %v968_v50 = vld [vmem:[#allocation7 + $0x120] sm:$0xff] }
 0x204   :  { %v1354_v52 = vmul.f32 -1.442695, %v419_v49  ;;  %v1664_v49 = vpack.c.bf16 %v879_v48, %v878_v47 }
 0x206   :  { %1702 = vpow2.f32 %v1354_v52  ;;  %v1060_v52 = vld [vmem:[#allocation7 + $0x140] sm:$0xff] }
 0x207   :  { %1704 = vtanh.f32 %v335_v53  ;;  %v1667_v53 = vpack.c.bf16 %v969_v51, %v968_v50 }
 0x208   :  { %v1701_v54 = vpop.eup %1700 }
 0x209   :  { %v252_v55 = vadd.f32 1.0, %v1701_v54  ;;  %v1061_v54 = vld [vmem:[#allocation7 + $0x148] sm:$0xff] }
 0x20b   :  { %1706 = vrcp.f32 %v252_v55  ;;  %v970_v55 = vld [vmem:[#allocation7 + $0x130] sm:$0xff] }
 0x210   :  { %v1703_v56 = vpop.eup %1702 }
 0x211   :  { %v425_v57 = vadd.f32 1.0, %v1703_v56  ;;  %v1705_v58 = vpop.eup %1704  ;;  %v971_v56 = vld [vmem:[#allocation7 + $0x138] sm:$0xff] }
 0x213   :  { %1708 = vrcp.f32 %v425_v57  ;;  %v1673_v57 = vpack.c.bf16 %v1061_v54, %v1060_v52 }
 0x215   :  { %v1707_v59 = vpop.eup %1706 }
 0x216   :  { %v428_v60 = vmul.f32 %v1707_v59, %v1705_v58  ;;  %v1062_v58 = vld [vmem:[#allocation7 + $0x150] sm:$0xff]  ;;  %v1063_v59 = vld [vmem:[#allocation7 + $0x158] sm:$0xff] }
 0x217   :  { %v1676_v61 = vpack.c.bf16 %v1063_v59, %v1062_v58  ;;  %v1388_v58 = vld [vmem:[%s2105_s6] ss:$0 sm:$0xff] }
 0x218   :  { %1710 = vtanh.f32 %v428_v60  ;;  %v1670_v60 = vpack.c.bf16 %v971_v56, %v970_v55 }
 0x21d   :  { %v1709_v63 = vpop.eup %1708 }
 0x222   :  { %v1711_v2 = vpop.eup %1710 }
 0x223   :  { %v430_v4 = vmul.f32 %v1711_v2, %v1709_v63 }
 0x225   :  { %1508 = vmatmul.mubr.msk.f32.vlgmr.msra.gmra.mrb[4].mxu0 %vm175_vm2, %v430_v4  ;;  %1519 = vmatmul.mubr.msk.f32.vlgmr.msra.gmra.mrb[4].mxu1 %vm175_vm2, %v430_v4 }
 0x226   :  { %1644 = vmatpush3.bf16.msra.mxu0 %v1643_v3  ;;  %1529 = vmatprep.mubr.msk.f32.mxu0 %vm1877_vm0, %v1878_v1 }
 0x227   :  { %1645 = vmatprep.subr.bf16.mxu0 %v1876_v0  ;;  %1540 = vmatprep.mubr.msk.f32.mxu1 %vm1877_vm0, %v1878_v1 }
 0x228   :  { %1650 = vmatpush3.bf16.msra.mxu1 %v1649_v11  ;;  %v1371_v11 = vld [vmem:[%s2103_s4 + $0x7] ss:$0 sm:$0xff] }
 0x229   :  { %1651 = vmatprep.subr.bf16.mxu1 %v1876_v0 }
 0x22a   :  { %1647 = vmatpush3.bf16.msra.mxu0 %v1646_v7  ;;  %v1374_v7 = vld [vmem:[%s2103_s4 + $0x8] ss:$0 sm:$0xff] }
 0x22b   :  { %1654 = vmatprep.subr.bf16.mxu0 %v1876_v0 }
 0x22c   :  { %1653 = vmatpush3.bf16.msra.mxu1 %v1652_v18 }
 0x22d   :  { %1530 = vmatmul.mubr.msk.f32.vlgmr.msra.gmra.mrb[6].mxu0 %vm175_vm2, %v430_v4  ;;  %1660 = vmatprep.subr.bf16.mxu1 %v1876_v0 }
 0x22e   :  { %1551 = vmatprep.mubr.msk.f32.mxu0 %vm1877_vm0, %v1878_v1  ;;  %1656 = vmatpush3.bf16.msra.mxu0 %v1655_v15 }
 0x22f   :  { %1657 = vmatprep.subr.bf16.mxu0 %v1876_v0 }
 0x232   :  { %1659 = vmatpush3.bf16.msra.mxu0 %v1658_v19 }
 0x233   :  { %1666 = vmatprep.subr.bf16.mxu0 %v1876_v0 }
 0x2f8   :  { %v513_v21 = vpop.f32.mrb[4].mxu0  ;;  %v602_v22 = vpop.f32.mrb[4].mxu1 }
 0x2f9   :  { %v514_v23 = vadd.f32 %v1356_v20, %v513_v21  ;;  %v1509_v24 = vpop.f32.mrb[5].mxu0  ;;  %v1520_v25 = vpop.f32.mrb[5].mxu1  ;;  %v603_v33 = vadd.f32 %v1360_v31, %v602_v22  ;;  %v1144_v21 = vld [vmem:[#allocation7 + $0x160] sm:$0xff]  ;;  %v1145_v22 = vld [vmem:[#allocation7 + $0x168] sm:$0xff] }
 0x2fa   :  { %v1679_v25 = vpack.c.bf16 %v1145_v22, %v1144_v21  ;;  %v1236_v31 = vld [vmem:[#allocation8 + $0x8] sm:$0xff] }
 0x2fb   :  { %v1358_v26 = vmul.f32 -1.442695, %v514_v23 }
 0x2fd   :  { %1712 = vpow2.f32 %v1358_v26 }
 0x300   :  { %v686_v28 = vpop.f32.mrb[6].mxu0 }
 0x301   :  { %v687_v29 = vadd.f32 %v1363_v27, %v686_v28  ;;  %v1531_v30 = vpop.f32.mrb[7].mxu0  ;;  %v1146_v27 = vld [vmem:[#allocation7 + $0x170] sm:$0xff]  ;;  %v1147_v28 = vld [vmem:[#allocation7 + $0x178] sm:$0xff] }
 0x302   :  { %v1235_v30 = vld [vmem:[#allocation8] sm:$0xff] }
 0x303   :  { %v1365_v32 = vmul.f32 -1.442695, %v687_v29  ;;  %v1682_v29 = vpack.c.bf16 %v1147_v28, %v1146_v27 }
 0x305   :  { %1714 = vpow2.f32 %v1365_v32  ;;  %v1237_v32 = vld [vmem:[#allocation8 + $0x10] sm:$0xff] }
 0x306   :  { %1716 = vtanh.f32 %v603_v33  ;;  %v1685_v33 = vpack.c.bf16 %v1236_v31, %v1235_v30 }
 0x307   :  { %v1713_v34 = vpop.eup %1712 }
 0x308   :  { %v520_v35 = vadd.f32 1.0, %v1713_v34  ;;  %v1238_v34 = vld [vmem:[#allocation8 + $0x18] sm:$0xff] }
 0x30a   :  { %1718 = vrcp.f32 %v520_v35  ;;  %v1688_v35 = vpack.c.bf16 %v1238_v34, %v1237_v32 }
 0x30f   :  { %v1715_v36 = vpop.eup %1714 }
 0x310   :  { %v693_v37 = vadd.f32 1.0, %v1715_v36  ;;  %v1717_v38 = vpop.eup %1716  ;;  %v1378_v36 = vld [vmem:[%s2103_s4 + $0x9] ss:$0 sm:$0xff] }
 0x312   :  { %1720 = vrcp.f32 %v693_v37 }
 0x314   :  { %v1719_v39 = vpop.eup %1718 }
 0x315   :  { %v696_v40 = vmul.f32 %v1719_v39, %v1717_v38 }
 0x317   :  { %1722 = vtanh.f32 %v696_v40 }
 0x31c   :  { %v1721_v43 = vpop.eup %1720 }
 0x321   :  { %v1723_v44 = vpop.eup %1722 }
 0x322   :  { %v698_v46 = vmul.f32 %v1723_v44, %v1721_v43 }
 0x324   :  { %1541 = vmatmul.mubr.msk.f32.vlgmr.msra.gmra.mrb[6].mxu1 %vm175_vm2, %v698_v46  ;;  %1552 = vmatmul.mubr.msk.f32.vlgmr.msra.gmra.mrb[8].mxu0 %vm175_vm2, %v698_v46 }
 0x325   :  { %1662 = vmatpush3.bf16.msra.mxu1 %v1661_v45  ;;  %1562 = vmatprep.mubr.msk.f32.mxu1 %vm1877_vm0, %v1878_v1 }
 0x326   :  { %1663 = vmatprep.subr.bf16.mxu1 %v1876_v0  ;;  %1573 = vmatprep.mubr.msk.f32.mxu0 %vm1877_vm0, %v1878_v1 }
 0x327   :  { %1668 = vmatpush3.bf16.msra.mxu0 %v1667_v53 }
 0x328   :  { %1669 = vmatprep.subr.bf16.mxu0 %v1876_v0 }
 0x329   :  { %1665 = vmatpush3.bf16.msra.mxu1 %v1664_v49 }
 0x32a   :  { %1672 = vmatprep.subr.bf16.mxu1 %v1876_v0 }
 0x32b   :  { %1671 = vmatpush3.bf16.msra.mxu0 %v1670_v60 }
 0x32c   :  { %1563 = vmatmul.mubr.msk.f32.vlgmr.msra.gmra.mrb[8].mxu1 %vm175_vm2, %v698_v46  ;;  %1678 = vmatprep.subr.bf16.mxu0 %v1876_v0 }
 0x32d   :  { %1584 = vmatprep.mubr.msk.f32.mxu1 %vm1877_vm0, %v1878_v1  ;;  %1674 = vmatpush3.bf16.msra.mxu1 %v1673_v57 }
 0x32e   :  { %1675 = vmatprep.subr.bf16.mxu1 %v1876_v0 }
 0x331   :  { %1677 = vmatpush3.bf16.msra.mxu1 %v1676_v61 }
 0x332   :  { %1684 = vmatprep.subr.bf16.mxu1 %v1876_v0 }
 0x3f7   :  { %v781_v63 = vpop.f32.mrb[6].mxu1  ;;  %v870_v2 = vpop.f32.mrb[8].mxu0 }
 0x3f8   :  { %v782_v3 = vadd.f32 %v1367_v62, %v781_v63  ;;  %v1542_v4 = vpop.f32.mrb[7].mxu1  ;;  %v1553_v5 = vpop.f32.mrb[9].mxu0  ;;  %v871_v13 = vadd.f32 %v1371_v11, %v870_v2 }
 0x3fa   :  { %v1369_v6 = vmul.f32 -1.442695, %v782_v3 }
 0x3fc   :  { %1724 = vpow2.f32 %v1369_v6 }
 0x3ff   :  { %v954_v8 = vpop.f32.mrb[8].mxu1 }
 0x400   :  { %v955_v9 = vadd.f32 %v1374_v7, %v954_v8  ;;  %v1564_v10 = vpop.f32.mrb[9].mxu1 }
 0x402   :  { %v1376_v12 = vmul.f32 -1.442695, %v955_v9 }
 0x404   :  { %1726 = vpow2.f32 %v1376_v12 }
 0x405   :  { %1728 = vtanh.f32 %v871_v13 }
 0x406   :  { %v1725_v14 = vpop.eup %1724 }
 0x407   :  { %v788_v15 = vadd.f32 1.0, %v1725_v14 }
 0x409   :  { %1730 = vrcp.f32 %v788_v15 }
 0x40e   :  { %v1727_v16 = vpop.eup %1726 }
 0x40f   :  { %v961_v17 = vadd.f32 1.0, %v1727_v16  ;;  %v1729_v18 = vpop.eup %1728 }
 0x411   :  { %1732 = vrcp.f32 %v961_v17 }
 0x413   :  { %v1731_v19 = vpop.eup %1730 }
 0x414   :  { %v964_v20 = vmul.f32 %v1731_v19, %v1729_v18 }
 0x416   :  { %1734 = vtanh.f32 %v964_v20 }
 0x41b   :  { %v1733_v23 = vpop.eup %1732 }
 0x420   :  { %v1735_v24 = vpop.eup %1734 }
 0x421   :  { %v966_v26 = vmul.f32 %v1735_v24, %v1733_v23 }
 0x423   :  { %1574 = vmatmul.mubr.msk.f32.vlgmr.msra.gmra.mrb[10].mxu0 %vm175_vm2, %v966_v26  ;;  %1585 = vmatmul.mubr.msk.f32.vlgmr.msra.gmra.mrb[10].mxu1 %vm175_vm2, %v966_v26 }
 0x424   :  { %1680 = vmatpush3.bf16.msra.mxu0 %v1679_v25  ;;  %1595 = vmatprep.mubr.msk.f32.mxu0 %vm1877_vm0, %v1878_v1 }
 0x425   :  { %1681 = vmatprep.subr.bf16.mxu0 %v1876_v0  ;;  %1606 = vmatprep.mubr.msk.f32.mxu1 %vm1877_vm0, %v1878_v1 }
 0x426   :  { %1686 = vmatpush3.bf16.msra.mxu1 %v1685_v33 }
 0x427   :  { %1687 = vmatprep.subr.bf16.mxu1 %v1876_v0  ;;  %v1382_v0 = vld [vmem:[%s2103_s4 + $0xa] ss:$0 sm:$0xff] }
 0x428   :  { %1683 = vmatpush3.bf16.msra.mxu0 %v1682_v29 }
 0x42a   :  { %1689 = vmatpush3.bf16.msra.mxu1 %v1688_v35 }
 0x42b   :  { %1596 = vmatmul.mubr.msk.f32.vlgmr.msra.gmra.mrb[12].mxu0 %vm175_vm2, %v966_v26 }
 0x4f6   :  { %v1049_v37 = vpop.f32.mrb[10].mxu0  ;;  %v1138_v38 = vpop.f32.mrb[10].mxu1 }
 0x4f7   :  { %v1050_v1 = vadd.f32 %v1378_v36, %v1049_v37  ;;  %v1575_v39 = vpop.f32.mrb[11].mxu0  ;;  %v1586_v40 = vpop.f32.mrb[11].mxu1  ;;  %v1139_v47 = vadd.f32 %v1382_v0, %v1138_v38 }
 0x4f9   :  { %v1380_v41 = vmul.f32 -1.442695, %v1050_v1 }
 0x4fb   :  { %1736 = vpow2.f32 %v1380_v41 }
 0x4fe   :  { %v1222_v43 = vpop.f32.mrb[12].mxu0 }
 0x4ff   :  { %v1223_v44 = vadd.f32 %v1385_v42, %v1222_v43  ;;  %v1597_v45 = vpop.f32.mrb[13].mxu0 }
 0x501   :  { %v1387_v46 = vmul.f32 -1.442695, %v1223_v44 }
 0x503   :  { %1738 = vpow2.f32 %v1387_v46 }
 0x504   :  { %1740 = vtanh.f32 %v1139_v47 }
 0x505   :  { %v1737_v48 = vpop.eup %1736 }
 0x506   :  { %v1056_v49 = vadd.f32 1.0, %v1737_v48 }
 0x508   :  { %1742 = vrcp.f32 %v1056_v49 }
 0x50d   :  { %v1739_v50 = vpop.eup %1738 }
 0x50e   :  { %v1229_v51 = vadd.f32 1.0, %v1739_v50  ;;  %v1741_v52 = vpop.eup %1740 }
 0x510   :  { %1744 = vrcp.f32 %v1229_v51 }
 0x512   :  { %v1743_v53 = vpop.eup %1742 }
 0x513   :  { %v1232_v54 = vmul.f32 %v1743_v53, %v1741_v52 }
 0x515   :  { %1746 = vtanh.f32 %v1232_v54 }
 0x51a   :  { %v1745_v55 = vpop.eup %1744 }
 0x51f   :  { %v1747_v56 = vpop.eup %1746 }
 0x520   :  { %v1234_v57 = vmul.f32 %v1747_v56, %v1745_v55 }
 0x522   :  { %1607 = vmatmul.mubr.msk.f32.vlgmr.msra.gmra.mrb[12].mxu1 %vm175_vm2, %v1234_v57 }
 0x5f5   :  { %v1315_v59 = vpop.f32.mrb[12].mxu1 }
 0x5f6   :  { %v1316_v60 = vadd.f32 %v1388_v58, %v1315_v59  ;;  %v1608_v61 = vpop.f32.mrb[13].mxu1 }
 0x5f8   :  { %v1390_v62 = vmul.f32 -1.442695, %v1316_v60 }
 0x5fa   :  { %1748 = vpow2.f32 %v1390_v62 }
 0x604   :  { %v1749_v63 = vpop.eup %1748 }
 0x605   :  { %v1322_v2 = vadd.f32 1.0, %v1749_v63 }
 0x607   :  { %1750 = vrcp.f32 %v1322_v2 }
 0x611   :  { %v1751_v3 = vpop.eup %1750 }
 0x612   :  { %1325 = vst [vmem:[#allocation10] sm:$0xff] %v1751_v3 }
 0x613   :  { %1851 = shalt.err (!%p1848_p8)
}
 0x614   :  { %s1852_s12 = scalar_lea.hbm %s2106_s7, 128 }
 0x615   :  { %p1853_p9 = scmp.ne.s32.totalorder %s2106_s7, %s1852_s12  ;;  %p1856_p10 = scmp.lt.u32.totalorder %s1852_s12, %s2106_s7 }
 0x617   :  { %p1858_p11 = pnand %p1856_p10, %p1853_p9 }
 0x619   :  { %1861 = shalt.err (!%p1858_p11)
}
 0x61a   :  { %1335 = dma.vmem_to_hbm [thread:$0]  %s1333_s5, 128, %s2106_s7, [#allocation4]  }
 0x61b   :  { %1868 = dma.done.wait [#allocation4], 128  }
 0x61c   :  { %1869 = vsyncadd [#allocation4], 4294967168 }
 0x61d   :  { %1339 = vsyncpa [#allocation3], 1 }
 0x61e   :  { %1340 = vsyncpa [#allocation6], 1 }
 0x61f   :  { %1341 = vsyncpa [#allocation9], 1 }
 0x620   :  { %1342 = vsyncpa [#allocation4], 1 }

</bundles_post_ra>
